<compile_context>
chip_gen: v7x
topology: tpu7x:2x2x1
jax: 0.10.0
libtpu: 0.0.40
codegen_flags: <defaults>
</compile_context>

<pallas_src>
import jax
import jax.numpy as jnp
from jax.experimental import pallas as pl
from jax.experimental.pallas import tpu as pltpu


# ----------------------------- kernels --------------------------------------

def _mlp_block(x_ref, w1_ref, b1_ref, w2_ref):
    """One hidden-block contribution: relu(x @ W1_blk + b1_blk) @ W2_blk (f32)."""
    h = jnp.dot(x_ref[...], w1_ref[...], preferred_element_type=jnp.float32)
    # Bias + ReLU in f32 on the VPU (v5e has no bf16 VALU).
    h = jnp.maximum(h + b1_ref[...].astype(jnp.float32), 0.0)
    # Deliberate downcast of the ReLU output to the weight dtype (bf16 when
    # compute_dtype=bf16) so the MXU runs at full rate; accumulation stays f32.
    return jnp.dot(h.astype(w2_ref.dtype), w2_ref[...],
                   preferred_element_type=jnp.float32)


def mlp_kernel_scratch_acc(x_ref, w1_ref, b1_ref, w2_ref, b2_ref, o_ref, acc_ref):
    """Generic path: f32 VMEM accumulator scratch, final cast to o_ref dtype."""
    h_idx = pl.program_id(1)
    y = _mlp_block(x_ref, w1_ref, b1_ref, w2_ref)

    @pl.when(h_idx == 0)
    def _first():                       # write, not zero-init + RMW
        acc_ref[...] = y

    @pl.when(h_idx > 0)
    def _accum():
        acc_ref[...] += y

    @pl.when(h_idx == pl.num_programs(1) - 1)
    def _finalize():
        o_ref[...] = (acc_ref[...] + b2_ref[...].astype(jnp.float32)
                      ).astype(o_ref.dtype)


def mlp_kernel_out_acc(x_ref, w1_ref, b1_ref, w2_ref, b2_ref, o_ref):
    """f32-output path: accumulate directly into the output tile (no scratch)."""
    h_idx = pl.program_id(1)
    y = _mlp_block(x_ref, w1_ref, b1_ref, w2_ref)

    @pl.when(h_idx == 0)
    def _first():
        o_ref[...] = y

    @pl.when(h_idx > 0)
    def _accum():
        o_ref[...] += y

    @pl.when(h_idx == pl.num_programs(1) - 1)
    def _finalize():
        o_ref[...] += b2_ref[...].astype(jnp.float32)


# --------------------------- tiling heuristics -------------------------------

def _round_up(x, n):
    return ((x + n - 1) // n) * n


def _vmem_budget_bytes():
    """~80% of this generation's VMEM (128 MiB v5e/v6e, 64 MiB per TC on v7x)."""
    try:
        cap = int(pltpu.get_tpu_info().vmem_capacity_bytes)
    except Exception:
        cap = 64 * 1024 * 1024          # conservative fallback = v7x per-TC VMEM
    cap = max(32 * 1024 * 1024, min(cap, 128 * 1024 * 1024))
    return int(cap * 0.8)


def _vmem_bytes(tm, th, d_model, in_isz, out_isz, b_isz, use_scratch):
    return (2 * tm * d_model * in_isz            # x tiles (double-buffered)
            + 2 * tm * d_model * out_isz         # out tiles (double-buffered)
            + 4 * d_model * th * in_isz          # W1 + W2 blocks (double-buffered)
            + 2 * (th + d_model) * b_isz         # bias blocks
            + (tm * d_model * 4 if use_scratch else 0)   # f32 accumulator scratch
            + tm * th * 4)                       # (tm, th) f32 intermediate


def _select_tiles(m, d_model, hidden, in_isz, out_isz, b_isz, budget, use_scratch):
    mp16 = _round_up(max(m, 1), 16)
    # Row-tile candidates: as large as fits (weight re-streaming is per M tile),
    # preferring 256-multiples for the v6e/v7x 256x256 MXU.
    tm_cands = ([mp16] if mp16 <= 1024 else []) + \
               [t for t in (1024, 768, 512, 256, 128, 64, 32, 16) if t < mp16]
    # Hidden-tile candidates: keep full weights resident when small (grid-
    # invariant blocks, no re-streaming); else 512/256/128-aligned divisors.
    if 4 * d_model * hidden * in_isz <= budget // 3:
        th_cands = [hidden]
    else:
        th_cands = [t for t in (1024, 512, 256, 128)
                    if t < hidden and hidden % t == 0] or [hidden]
    # Prefer shrinking th before tm when VMEM-constrained (v7x).
    for tm in tm_cands:
        for th in th_cands:
            if _vmem_bytes(tm, th, d_model, in_isz, out_isz, b_isz,
                           use_scratch) <= budget:
                return tm, th
    return tm_cands[-1], th_cands[-1]


# ------------------------------ wrapper --------------------------------------

def mlp_forward(x, w1, b1, w2, b2, *, tm=None, th=None,
                compute_dtype=jnp.bfloat16, vmem_budget_bytes=None,
                core_parallel_m=False):
    """x: (..., d_model) -> same shape.  w1:(D,H), w2:(H,D) already (in, out).

    compute_dtype: dtype for the matmul operands (default bf16, f32 accum);
                   None keeps the input dtype (exact f32 path for f32 inputs).
    core_parallel_m: set True on v7x to shard the M axis across both TensorCores.
    """
    orig_shape = x.shape
    d_model = orig_shape[-1]
    hidden = w1.shape[1]
    assert w1.shape == (d_model, hidden) and w2.shape == (hidden, d_model)
    assert b1.shape == (hidden,) and b2.shape == (d_model,)

    out_dtype = x.dtype
    if compute_dtype is not None:
        x = x.astype(compute_dtype)
        w1 = w1.astype(compute_dtype)
        w2 = w2.astype(compute_dtype)

    x2d = x.reshape(-1, d_model)
    m = x2d.shape[0]

    in_isz = jnp.dtype(x2d.dtype).itemsize
    out_isz = jnp.dtype(out_dtype).itemsize
    b_isz = jnp.dtype(b1.dtype).itemsize

    budget = (vmem_budget_bytes if vmem_budget_bytes is not None
              else _vmem_budget_bytes())

    # f32 output -> accumulate directly into the output tile, no f32 scratch.
    use_scratch = jnp.dtype(out_dtype) != jnp.dtype(jnp.float32)

    # Ragged hidden dims that must be streamed: zero-pad to a 128 multiple
    # (exact: padded W1 cols / b1 entries are zero, padded W2 rows are zero).
    if hidden % 128 != 0 and 4 * d_model * hidden * in_isz > budget // 3:
        hpad = _round_up(hidden, 128) - hidden
        w1 = jnp.pad(w1, ((0, 0), (0, hpad)))
        b1 = jnp.pad(b1, ((0, hpad),))
        w2 = jnp.pad(w2, ((0, hpad), (0, 0)))
        hidden += hpad

    tm_auto, th_auto = _select_tiles(m, d_model, hidden, in_isz, out_isz, b_isz,
                                     budget, use_scratch)
    if tm is None:
        tm = tm_auto
    else:
        tm = max(8, min(_round_up(tm, 8), _round_up(max(m, 1), 8)))
    if th is None:
        th = th_auto
    else:
        assert hidden % th == 0 and (th == hidden or th % 128 == 0), \
            "th must divide hidden and be a 128-multiple (or equal hidden)"

    # Pad ragged token counts with zero rows (sliced off after the call).
    m_pad = (-m) % tm
    if m_pad:
        x2d = jnp.pad(x2d, ((0, m_pad), (0, 0)))
    mp = m + m_pad
    num_m = mp // tm
    num_h = hidden // th

    b1r = b1.reshape(1, hidden)
    b2r = b2.reshape(1, d_model)

    est = _vmem_bytes(tm, th, d_model, in_isz, out_isz, b_isz, use_scratch)
    vmem_limit = int(min(max(2 * est, budget), 128 * 1024 * 1024))

    cost = pl.CostEstimate(
        flops=int(4 * mp * d_model * hidden),         # two matmuls
        transcendentals=0,
        bytes_accessed=int(mp * d_model * (in_isz + out_isz)
                           + num_m * (w1.size + w2.size) * in_isz
                           + num_m * num_h * (th + d_model) * b_isz),
    )

    kernel = mlp_kernel_scratch_acc if use_scratch else mlp_kernel_out_acc
    scratch = ((pltpu.VMEM((tm, d_model), jnp.float32),) if use_scratch else ())

    m_sem = pltpu.CORE_PARALLEL if core_parallel_m else "parallel"

    out = pl.pallas_call(
        kernel,
        out_shape=jax.ShapeDtypeStruct((mp, d_model), out_dtype),
        grid_spec=pltpu.PrefetchScalarGridSpec(
            num_scalar_prefetch=0,
            grid=(num_m, num_h),                               # reduction axis last
            in_specs=[
                pl.BlockSpec((tm, d_model), lambda i, h: (i, 0)),   # x row tile
                pl.BlockSpec((d_model, th), lambda i, h: (0, h)),   # W1 col block
                pl.BlockSpec((1, th),       lambda i, h: (0, h)),   # b1 block
                pl.BlockSpec((th, d_model), lambda i, h: (h, 0)),   # W2 row block
                pl.BlockSpec((1, d_model),  lambda i, h: (0, 0)),   # b2 (tiny)
            ],
            out_specs=pl.BlockSpec((tm, d_model), lambda i, h: (i, 0)),
            scratch_shapes=scratch,
        ),
        compiler_params=pltpu.CompilerParams(
            dimension_semantics=(m_sem, "arbitrary"),
            vmem_limit_bytes=vmem_limit,
        ),
        cost_estimate=cost,
    )(x2d, w1, b1r, w2, b2r)

    if m_pad:
        out = out[:m]
    return out.reshape(orig_shape)


def init_mlp_params(key, d_model, hidden_dim, dtype=jnp.float32):
    """Deterministic synthetic init matching nn.Linear shapes.
    fc1: weight (hidden, d_model), bias (hidden,)
    fc2: weight (d_model, hidden), bias (d_model,)
    Stored pre-transposed as (in, out) for the kernel."""
    k1, k2, k3, k4 = jax.random.split(key, 4)
    s1 = 1.0 / jnp.sqrt(d_model)
    s2 = 1.0 / jnp.sqrt(hidden_dim)
    w1 = jax.random.uniform(k1, (d_model, hidden_dim), dtype, -s1, s1)  # fc1.weight.T
    b1 = jax.random.uniform(k2, (hidden_dim,), dtype, -s1, s1)
    w2 = jax.random.uniform(k3, (hidden_dim, d_model), dtype, -s2, s2)  # fc2.weight.T
    b2 = jax.random.uniform(k4, (d_model,), dtype, -s2, s2)
    return w1, b1, w2, b2


if __name__ == "__main__":
    key = jax.random.PRNGKey(0)
    kx1, kp1, kx2, kp2 = jax.random.split(key, 4)

    # --- Test 1: tiny spec-sized shapes, exact f32 path (auto tiles, num_h=1) -
    batch, seq, d_model, hidden_dim = 2, 8, 32, 64
    x = jax.random.normal(kx1, (batch, seq, d_model), jnp.float32)
    w1, b1, w2, b2 = init_mlp_params(kp1, d_model, hidden_dim)

    out = jax.block_until_ready(mlp_forward(x, w1, b1, w2, b2, compute_dtype=None))
    ref = jnp.maximum(x @ w1 + b1, 0.0) @ w2 + b2
    assert out.shape == x.shape and out.dtype == x.dtype
    assert jnp.allclose(out, ref, atol=1e-5, rtol=1e-5), "f32 tiny check failed"

    # --- Test 2: M tiling (ragged pad) + hidden-axis accumulation, exact f32 --
    batch2, seq2, dm2, hd2 = 2, 20, 128, 256          # m = 40 tokens
    x2 = jax.random.normal(kx2, (batch2, seq2, dm2), jnp.float32)
    w1b, b1b, w2b, b2b = init_mlp_params(kp2, dm2, hd2)
    ref2 = jnp.maximum(x2 @ w1b + b1b, 0.0) @ w2b + b2b

    out2 = jax.block_until_ready(
        mlp_forward(x2, w1b, b1b, w2b, b2b, tm=16, th=128, compute_dtype=None))
    assert out2.shape == x2.shape
    assert jnp.allclose(out2, ref2, atol=1e-4, rtol=1e-4), "f32 tiled check failed"

    # --- Test 3: default path = bf16 matmul operands, f32 accumulation,
    #             output-resident f32 accumulator (no scratch) ----------------
    out3 = jax.block_until_ready(mlp_forward(x2, w1b, b1b, w2b, b2b))
    assert out3.dtype == x2.dtype
    assert jnp.allclose(out3, ref2, atol=5e-2, rtol=5e-2), "bf16 auto check failed"

    out3b = jax.block_until_ready(mlp_forward(x2, w1b, b1b, w2b, b2b, tm=16, th=128))
    assert jnp.allclose(out3b, ref2, atol=5e-2, rtol=5e-2), "bf16 tiled check failed"

    # --- Test 4: bf16 activations in/out -> f32 scratch-accumulator path ------
    x2bf = x2.astype(jnp.bfloat16)
    out4 = jax.block_until_ready(mlp_forward(x2bf, w1b, b1b, w2b, b2b, tm=16, th=128))
    assert out4.dtype == jnp.bfloat16
    assert jnp.allclose(out4.astype(jnp.float32), ref2, atol=1e-1, rtol=1e-1), \
        "bf16 io check failed"

    print("KERNEL_OK")
</pallas_src>

<mosaic_0001>
module attributes {stable_mosaic.version = 11 : i64} {
  func.func @mlp_kernel_out_acc(%arg0: i32, %arg1: i32, %arg2: memref<16x32xf32, #tpu.memory_space<vmem>>, %arg3: memref<32x64xf32, #tpu.memory_space<vmem>>, %arg4: memref<1x64xf32, #tpu.memory_space<vmem>>, %arg5: memref<64x32xf32, #tpu.memory_space<vmem>>, %arg6: memref<1x32xf32, #tpu.memory_space<vmem>>, %arg7: memref<16x32xf32, #tpu.memory_space<vmem>>) attributes {dimension_semantics = [#tpu.dimension_semantics<parallel>, #tpu.dimension_semantics<arbitrary>], iteration_bounds = array<i64: 1, 1>, scalar_prefetch = 0 : i64, scratch_operands = 0 : i64, tpu.core_type = #tpu.core_type<tc>, window_params = [{transform_indices = @transform_0, window_bounds = array<i64: 16, 32>}, {transform_indices = @transform_1, window_bounds = array<i64: 32, 64>}, {transform_indices = @transform_2, window_bounds = array<i64: 1, 64>}, {transform_indices = @transform_3, window_bounds = array<i64: 64, 32>}, {pipeline_mode = #tpu.pipeline_mode<synchronous>, transform_indices = @transform_4, window_bounds = array<i64: 1, 32>}, {transform_indices = @transform_5, window_bounds = array<i64: 16, 32>}]} {
    %c0 = arith.constant 0 : index
    %c0_0 = arith.constant 0 : index
    %0 = vector.load %arg2[%c0, %c0_0] : memref<16x32xf32, #tpu.memory_space<vmem>>, vector<16x32xf32>
    %c0_1 = arith.constant 0 : index
    %c0_2 = arith.constant 0 : index
    %1 = vector.load %arg3[%c0_1, %c0_2] : memref<32x64xf32, #tpu.memory_space<vmem>>, vector<32x64xf32>
    %cst = arith.constant dense<0.000000e+00> : vector<16x64xf32>
    %2 = tpu.matmul %0, %1, %cst {dimension_numbers = #tpu.dot_dimension_numbers<[1], [0], [0], [1], [0, 0, 1, 1], [], []>} : vector<16x32xf32>, vector<32x64xf32>, vector<16x64xf32> -> vector<16x64xf32>
    %c0_3 = arith.constant 0 : index
    %c0_4 = arith.constant 0 : index
    %3 = vector.load %arg4[%c0_3, %c0_4] : memref<1x64xf32, #tpu.memory_space<vmem>>, vector<1x64xf32>
    %4 = vector.broadcast %3 : vector<1x64xf32> to vector<16x64xf32>
    %5 = arith.addf %2, %4 : vector<16x64xf32>
    %cst_5 = arith.constant 0.000000e+00 : f32
    %6 = vector.broadcast %cst_5 : f32 to vector<16x64xf32>
    %7 = arith.maximumf %5, %6 : vector<16x64xf32>
    %c0_6 = arith.constant 0 : index
    %c0_7 = arith.constant 0 : index
    %8 = vector.load %arg5[%c0_6, %c0_7] : memref<64x32xf32, #tpu.memory_space<vmem>>, vector<64x32xf32>
    %cst_8 = arith.constant dense<0.000000e+00> : vector<16x32xf32>
    %9 = tpu.matmul %7, %8, %cst_8 {dimension_numbers = #tpu.dot_dimension_numbers<[1], [0], [0], [1], [0, 0, 1, 1], [], []>} : vector<16x64xf32>, vector<64x32xf32>, vector<16x32xf32> -> vector<16x32xf32>
    %c0_i32 = arith.constant 0 : i32
    %10 = arith.cmpi eq, %arg1, %c0_i32 : i32
    %11 = arith.extui %10 : i1 to i32
    %c0_i32_9 = arith.constant 0 : i32
    %12 = arith.cmpi ne, %11, %c0_i32_9 : i32
    scf.if %12 {
      %c0_14 = arith.constant 0 : index
      %c0_15 = arith.constant 0 : index
      %19 = vector.load %arg7[%c0_14, %c0_15] : memref<16x32xf32, #tpu.memory_space<vmem>>, vector<16x32xf32>
      tpu.vector_store %arg7[%c0_14, %c0_15], %9 {strides = array<i32>} : memref<16x32xf32, #tpu.memory_space<vmem>>, vector<16x32xf32>,
    } else {
    }
    %c0_i32_10 = arith.constant 0 : i32
    %13 = arith.cmpi sgt, %arg1, %c0_i32_10 : i32
    %14 = arith.extui %13 : i1 to i32
    %c0_i32_11 = arith.constant 0 : i32
    %15 = arith.cmpi ne, %14, %c0_i32_11 : i32
    scf.if %15 {
      %c0_14 = arith.constant 0 : index
      %c0_15 = arith.constant 0 : index
      %19 = vector.load %arg7[%c0_14, %c0_15] : memref<16x32xf32, #tpu.memory_space<vmem>>, vector<16x32xf32>
      %20 = arith.addf %19, %9 : vector<16x32xf32>
      %c0_16 = arith.constant 0 : index
      %c0_17 = arith.constant 0 : index
      %21 = vector.load %arg7[%c0_16, %c0_17] : memref<16x32xf32, #tpu.memory_space<vmem>>, vector<16x32xf32>
      tpu.vector_store %arg7[%c0_16, %c0_17], %20 {strides = array<i32>} : memref<16x32xf32, #tpu.memory_space<vmem>>, vector<16x32xf32>,
    } else {
    }
    %c0_i32_12 = arith.constant 0 : i32
    %16 = arith.cmpi eq, %arg1, %c0_i32_12 : i32
    %17 = arith.extui %16 : i1 to i32
    %c0_i32_13 = arith.constant 0 : i32
    %18 = arith.cmpi ne, %17, %c0_i32_13 : i32
    scf.if %18 {
      %c0_14 = arith.constant 0 : index
      %c0_15 = arith.constant 0 : index
      %19 = vector.load %arg7[%c0_14, %c0_15] : memref<16x32xf32, #tpu.memory_space<vmem>>, vector<16x32xf32>
      %c0_16 = arith.constant 0 : index
      %c0_17 = arith.constant 0 : index
      %20 = vector.load %arg6[%c0_16, %c0_17] : memref<1x32xf32, #tpu.memory_space<vmem>>, vector<1x32xf32>
      %21 = vector.broadcast %20 : vector<1x32xf32> to vector<16x32xf32>
      %22 = arith.addf %19, %21 : vector<16x32xf32>
      %c0_18 = arith.constant 0 : index
      %c0_19 = arith.constant 0 : index
      %23 = vector.load %arg7[%c0_18, %c0_19] : memref<16x32xf32, #tpu.memory_space<vmem>>, vector<16x32xf32>
      tpu.vector_store %arg7[%c0_18, %c0_19], %22 {strides = array<i32>} : memref<16x32xf32, #tpu.memory_space<vmem>>, vector<16x32xf32>,
    } else {
    }
    return
  }
  func.func @transform_0(%arg0: i32, %arg1: i32) -> (i32, i32) {
    %c0_i32 = arith.constant 0 : i32
    %c0_i32_0 = arith.constant 0 : i32
    return %arg0, %c0_i32 : i32, i32
  }
  func.func @transform_1(%arg0: i32, %arg1: i32) -> (i32, i32) {
    %c0_i32 = arith.constant 0 : i32
    %c0_i32_0 = arith.constant 0 : i32
    return %c0_i32, %arg1 : i32, i32
  }
  func.func @transform_2(%arg0: i32, %arg1: i32) -> (i32, i32) {
    %c0_i32 = arith.constant 0 : i32
    %c0_i32_0 = arith.constant 0 : i32
    return %c0_i32, %arg1 : i32, i32
  }
  func.func @transform_3(%arg0: i32, %arg1: i32) -> (i32, i32) {
    %c0_i32 = arith.constant 0 : i32
    %c0_i32_0 = arith.constant 0 : i32
    return %arg1, %c0_i32 : i32, i32
  }
  func.func @transform_4(%arg0: i32, %arg1: i32) -> (i32, i32) {
    %c0_i32 = arith.constant 0 : i32
    %c0_i32_0 = arith.constant 0 : i32
    %c0_i32_1 = arith.constant 0 : i32
    return %c0_i32, %c0_i32_0 : i32, i32
  }
  func.func @transform_5(%arg0: i32, %arg1: i32) -> (i32, i32) {
    %c0_i32 = arith.constant 0 : i32
    %c0_i32_0 = arith.constant 0 : i32
    return %arg0, %c0_i32 : i32, i32
  }
}

</mosaic_0001>

<bundles_post_ra>
// kernel: tpu_custom_call.1
= control target key start
LH: loop header
LB: loop body
LE: loop exit
PB: predicated region body
PF: predicated region fallthrough
CT: control target
= control target key end

     0   :  { %vm34_vm0 = vcmask 261120   ;;  %s458_s0 = inlined_call_operand.vmem [shape: f32[16,32], index: 0, kind: input, shape index: {}]   ;;  %s459_s1 = inlined_call_operand.vmem [shape: f32[32,64], index: 1, kind: input, shape index: {}]   ;;  %s460_s2 = inlined_call_operand.vmem [shape: f32[1,64], index: 2, kind: input, shape index: {}]   ;;  %s461_s3 = inlined_call_operand.vmem [shape: f32[64,32], index: 3, kind: input, shape index: {}]   ;;  %s462_s4 = inlined_call_operand.vmem [shape: f32[1,32], index: 4, kind: input, shape index: {}]   ;;  %s463_s5 = inlined_call_operand.hbm [shape: f32[16,32], index: 5, kind: output, shape index: {}]  }
   0x1   :  { %v23_v0 = vld [vmem:[%s459_s1] sm:$0xff]  ;;  %v24_v1 = vld [vmem:[%s459_s1 + $0x8] sm:$0xff]  ;;  %v25_v2 = vld [vmem:[%s459_s1 + $0x10] sm:$0xff] }
   0x2   :  { %v308_v3 = vpack.c.bf16 %v24_v1, %v23_v0  ;;  %v26_v4 = vld [vmem:[%s459_s1 + $0x18] sm:$0xff]  ;;  %v21_v5 = vld [vmem:[%s458_s0] sm:$0xff]  ;;  %v119_v8 = vld [vmem:[%s461_s3 + $0x8] sm:$0xff] }
   0x3   :  { %v312_v6 = vpack.c.bf16 %v26_v4, %v25_v2  ;;  %286 = vmatprep.mubr.msk.f32.mxu0 %vm34_vm0, %v21_v5  ;;  %v118_v7 = vld [vmem:[%s461_s3] sm:$0xff]  ;;  %v120_v9 = vld [vmem:[%s461_s3 + $0x10] sm:$0xff]  ;;  %v121_v11 = vld [vmem:[%s461_s3 + $0x18] sm:$0xff] }
   0x4   :  { %309 = vmatprep.subr.bf16.mxu0 %v308_v3  ;;  %v316_v10 = vpack.c.bf16 %v119_v8, %v118_v7  ;;  %v320_v12 = vpack.c.bf16 %v121_v11, %v120_v9  ;;  %v122_v13 = vld [vmem:[%s461_s3 + $0x20] sm:$0xff]  ;;  %v123_v14 = vld [vmem:[%s461_s3 + $0x28] sm:$0xff] }
   0x5   :  { %311 = vmatpush3.bf16.msra.mxu0 %v308_v3 }
   0x6   :  { %10 = vsyncpa [#allocation3], 0  ;;  %313 = vmatprep.subr.bf16.mxu0 %v312_v6  ;;  %317 = vmatprep.subr.bf16.mxu1 %v316_v10  ;;  %v324_v15 = vpack.c.bf16 %v123_v14, %v122_v13  ;;  %v22_v16 = vld [vmem:[%s458_s0 + $0x8] sm:$0xff]  ;;  %v124_v17 = vld [vmem:[%s461_s3 + $0x30] sm:$0xff]  ;;  %vm126_vm1 = vcmask 523264  }
   0x7   :  { %319 = vmatpush3.bf16.msra.mxu1 %v316_v10  ;;  %v125_v18 = vld [vmem:[%s461_s3 + $0x38] sm:$0xff]  ;;  %v256_v20 = vld [vmem:[%s460_s2] ss:$0 sm:$0xff]  ;;  %s359_s2 = smov [#allocation2]  }
   0x8   :  { %321 = vmatprep.subr.bf16.mxu1 %v320_v12  ;;  %v328_v19 = vpack.c.bf16 %v125_v18, %v124_v17  ;;  %v261_v29 = vld [vmem:[%s462_s4] ss:$0 sm:$0xff]  ;;  %s245_s22 = sshll.u32 %s359_s2, 4  ;;  %s246_s22 = int_to_ptr.vmem [resolvable:$true] %s245_s22 }
   0x9   :  { %315 = vmatpush3.bf16.msra.mxu0 %v312_v6  ;;  %s335_s23 = scalar_lea.vmem %s246_s22, 256  ;;  %p340_p1 = scmp.lt.s32.totalorder %s246_s22, %s246_s22 }
   0xa   :  { %p336_p0 = scmp.ne.s32.totalorder %s246_s22, %s335_s23  ;;  %p341_p2 = scmp.lt.s32.totalorder %s335_s23, %s335_s23 }
   0xb   :  { %323 = vmatpush3.bf16.msra.mxu1 %v320_v12 }
   0xc   :  { %287 = vmatmul.mubr.msk.f32.vlgmr.msra.gmra.mrb[0].mxu0 %vm34_vm0, %v22_v16  ;;  %325 = vmatprep.subr.bf16.mxu1 %v324_v15  ;;  %p342_p3 = por %p341_p2, %p340_p1 }
   0xe   :  { %p343_p4 = pnand %p342_p3, %p336_p0 }
   0xf   :  { %327 = vmatpush3.bf16.msra.mxu1 %v324_v15 }
  0x10   :  { %329 = vmatprep.subr.bf16.mxu1 %v328_v19 }
  0x13   :  { %331 = vmatpush3.bf16.msra.mxu1 %v328_v19 }
  0xdf   :  { %v288_v21 = vpop.f32.mrb[0].mxu0 }
  0xe0   :  { %v113_v22 = vadd.f32 %v288_v21, %v256_v20  ;;  %v107_v23 = vpop.f32.mrb[1].mxu0 }
  0xe1   :  { %v108_v24 = vadd.f32 %v256_v20, %v107_v23 }
  0xe2   :  { %v117_v26 = vmax.f32 %v113_v22, 0.0 }
  0xe3   :  { %v116_v25 = vmax.f32 %v108_v24, 0.0 }
  0xe5   :  { %305 = vmatprep.mubr.msk.f32.mxu1 %vm126_vm1, %v116_v25 }
  0xe6   :  { %306 = vmatmul.mubr.msk.f32.vlgmr.msra.gmra.mrb[0].mxu1 %vm126_vm1, %v117_v26 }
 0x1b9   :  { %v307_v27 = vpop.f32.mrb[0].mxu1 }
 0x1ba   :  { %213 = vst.msk [vmem:[#allocation2 + $0x8] sm:$0xff] %vm34_vm0, %v307_v27  ;;  %v199_v28 = vpop.f32.mrb[1].mxu1 }
 0x1bb   :  { %212 = vst.msk [vmem:[#allocation2] sm:$0xff] %vm34_vm0, %v199_v28 }
 0x1c1   :  { %v228_v30 = vld [vmem:[#allocation2 + $0x8] sm:$0xff] }
 0x1c2   :  { %v237_v31 = vadd.f32 %v261_v29, %v228_v30  ;;  %v227_v32 = vld [vmem:[#allocation2] sm:$0xff] }
 0x1c3   :  { %v236_v33 = vadd.f32 %v261_v29, %v227_v32 }
 0x1c4   :  { %239 = vst.msk [vmem:[#allocation2 + $0x8] sm:$0xff] %vm34_vm0, %v237_v31 }
 0x1c5   :  { %238 = vst.msk [vmem:[#allocation2] sm:$0xff] %vm34_vm0, %v236_v33 }
 0x1c6   :  { %346 = shalt.err (!%p343_p4)
}
 0x1c7   :  { %s347_s25 = scalar_lea.hbm %s463_s5, 256 }
 0x1c8   :  { %p348_p5 = scmp.ne.s32.totalorder %s463_s5, %s347_s25  ;;  %p351_p6 = scmp.lt.u32.totalorder %s347_s25, %s463_s5 }
 0x1ca   :  { %p353_p7 = pnand %p351_p6, %p348_p5 }
 0x1cc   :  { %356 = shalt.err (!%p353_p7)
}
 0x1cd   :  { %s360_s30 = smov 128   ;;  %s361_s6 = smov 8  }
 0x1ce   :  { %251 = dma.vmem_to_hbm [thread:$0]  %s246_s22, 256, %s463_s5, [#allocation3], %s360_s30, %s360_s30, %s361_s6  }
 0x1cf   :  { %357 = dma.done.wait [#allocation3], 256  }
 0x1d0   :  { %358 = vsyncadd [#allocation3], 4294967040 }
 0x1d1   :  { %255 = vsyncpa [#allocation3], 1 }

</bundles_post_ra>
